<compile_context>
chip_gen: v7x
topology: tpu7x:2x2x1
jax: 0.10.0
libtpu: 0.0.40
codegen_flags: <defaults>
</compile_context>

<pallas_src>
import jax
import jax.numpy as jnp
from jax import lax
from jax.experimental import pallas as pl
from jax.experimental.pallas import tpu as pltpu


def _round_up(v, m):
    return (v + m - 1) // m * m


def _make_kernel(SA_pad, Kb, r_wb, r_wc, r_w3):
    """Kernel with static layer sizes / slab offsets baked in."""

    def kernel(x_ref, w_ref, b_ref, out_ref):
        f32 = jnp.float32
        x = x_ref[...]                                        # (TB, SA_pad) compute dtype

        # ---- layer 1: h = ReLU(states @ W1.T + b1), width padded to H2p ----
        # Slab rows [0, S) hold W1.T; action / pad rows are zero, so the action
        # and pad columns of x contribute exactly 0.
        h = jnp.dot(x, w_ref[0:SA_pad, :], preferred_element_type=f32)
        h = jnp.maximum(h + b_ref[0:1, :], 0.0)               # (TB, H2p); cols >= H are 0

        # ---- layer 2: z = ReLU(concat([h, a]) @ W2.T + b2) via split matmul ----
        # Only the first Kb (= round_up(H, align)) columns of h can be nonzero,
        # so the h-side matmul runs with K = Kb instead of 2H.
        z = (jnp.dot(h[:, :Kb].astype(x.dtype), w_ref[r_wb:r_wb + Kb, :],
                     preferred_element_type=f32)
             + jnp.dot(x, w_ref[r_wc:r_wc + SA_pad, :], preferred_element_type=f32)
             + b_ref[1:2, :])
        z = jnp.maximum(z, 0.0)                               # (TB, H2p) f32

        # ---- layer 3: q = z @ W3.T + b3, emitted as a lane-dense (1, TB) row ----
        # Transposed-RHS matmul on the MXU (same contraction pattern as q @ k.T):
        # no XLU lane-reduce, no (TB,1)->(1,TB) transpose.
        w3 = w_ref[r_w3:r_w3 + 1, :].astype(f32)              # (1, H2p)
        q_row = lax.dot_general(w3, z, (((1,), (1,)), ((), ())),
                                preferred_element_type=f32)   # (1, TB)
        out_ref[...] = (q_row + b_ref[2:3, 0:1]).astype(out_ref.dtype)

    return kernel


def _pack_params(params, compute_dtype):
    """Pack PyTorch-layout weights into one sublane-aligned, lane-full slab."""
    W1, b1 = params["W1"], params["b1"]
    W2, b2 = params["W2"], params["b2"]
    W3, b3 = params["W3"], params["b3"]
    H, S = W1.shape
    H2, HA = W2.shape
    A = HA - H
    SA = S + A

    itemsize = jnp.dtype(compute_dtype).itemsize
    align = 8 * (4 // itemsize)            # 8 rows (f32) / 16 rows (bf16) per sublane tile
    SA_pad = _round_up(SA, align)          # aligned K for the x-side matmuls
    Kb = _round_up(H, align)               # aligned K for the h-side matmul
    H2p = _round_up(H2, 128)               # lane-full width for slab / h / z / biases

    r_wb = SA_pad                          # layer-2 h-part block
    r_wc = SA_pad + Kb                     # layer-2 action-part block
    r_w3 = r_wc + SA_pad                   # layer-3 row
    R = r_w3 + align                       # total rows (multiple of align)

    w = jnp.zeros((R, H2p), jnp.float32)
    w = w.at[0:S, 0:H].set(W1.T)                            # layer 1
    w = w.at[r_wb:r_wb + H, 0:H2].set(W2[:, :H].T)          # layer 2 (value part)
    w = w.at[r_wc + S:r_wc + SA, 0:H2].set(W2[:, H:].T)     # layer 2 (action part)
    w = w.at[r_w3, 0:H2].set(W3[0])                         # layer 3 row
    w_slab = w.astype(compute_dtype)

    b_slab = (jnp.zeros((3, H2p), jnp.float32)
              .at[0, 0:H].set(b1)          # b1 (zero-padded)
              .at[1, 0:H2].set(b2)         # b2 (zero-padded)
              .at[2, 0].set(b3[0]))        # b3 scalar

    meta = dict(S=S, A=A, SA=SA, H=H, H2=H2, SA_pad=SA_pad, Kb=Kb, H2p=H2p,
                r_wb=r_wb, r_wc=r_wc, r_w3=r_w3, R=R, align=align)
    return w_slab, b_slab, meta


def qnetwork_forward(states, actions, params, *, compute_dtype=jnp.bfloat16,
                     tb_cap=1024):
    """Pallas forward. states: (B, S), actions: (B, A) -> (B, 1) float32."""
    B, S = states.shape
    A = actions.shape[1]

    w_slab, b_slab, m = _pack_params(params, compute_dtype)
    assert m["S"] == S and m["A"] == A
    SA, SA_pad, H2p, R, align = m["SA"], m["SA_pad"], m["H2p"], m["R"], m["align"]

    # ---- balanced batch tiling ----
    # Small batches: one tile.  Larger batches: pick the step count first
    # (>= 2 so v7x megacore shards across both TensorCores), then balanced
    # 128-aligned tiles, which caps the zero-row pad waste.
    if B <= 128:
        grid_n = 1
        TB = _round_up(B, align)
    else:
        grid_n = max(2, pl.cdiv(B, tb_cap))
        TB = _round_up(pl.cdiv(B, grid_n), 128)
    B_pad = grid_n * TB

    # Glue: one packed activation input (feature dim padded to SA_pad).
    x = jnp.concatenate([states, actions], axis=1).astype(compute_dtype)   # (B, S+A)
    x = jnp.pad(x, ((0, B_pad - B), (0, SA_pad - SA)))                     # (B_pad, SA_pad)

    itemsize = jnp.dtype(compute_dtype).itemsize
    cost = pl.CostEstimate(
        flops=2 * B * (S * m["H"] + (m["H"] + A) * m["H2"] + m["H2"]),
        transcendentals=0,
        bytes_accessed=(x.size + w_slab.size) * itemsize + b_slab.size * 4 + B_pad * 4,
    )

    out = pl.pallas_call(
        _make_kernel(SA_pad, m["Kb"], m["r_wb"], m["r_wc"], m["r_w3"]),
        out_shape=jax.ShapeDtypeStruct((1, B_pad), jnp.float32),
        grid=(grid_n,),
        in_specs=[
            pl.BlockSpec((TB, SA_pad), lambda i: (i, 0)),   # activations: tiled over batch
            pl.BlockSpec((R, H2p), lambda i: (0, 0)),       # weight slab: VMEM-resident
            pl.BlockSpec((3, H2p), lambda i: (0, 0)),       # bias slab:   VMEM-resident
        ],
        out_specs=pl.BlockSpec((1, TB), lambda i: (0, i)),  # lane-dense q row
        compiler_params=pltpu.CompilerParams(
            dimension_semantics=("parallel",),
            vmem_limit_bytes=48 * 1024 * 1024,
        ),
        cost_estimate=cost,
    )(x, w_slab, b_slab)

    return out.reshape(B_pad, 1)[:B]


def init_params(key, state_components, action_components, hidden_layer):
    """Deterministic synthetic parameters (PyTorch Linear shapes)."""
    H, S, A = hidden_layer, state_components, action_components
    ks = jax.random.split(key, 6)
    u = lambda k, shape, fan_in: jax.random.uniform(
        k, shape, jnp.float32, -1.0 / jnp.sqrt(fan_in), 1.0 / jnp.sqrt(fan_in))
    return {
        "W1": u(ks[0], (H, S), S),
        "b1": u(ks[1], (H,), S),
        "W2": u(ks[2], (2 * H, H + A), H + A),
        "b2": u(ks[3], (2 * H,), H + A),
        "W3": u(ks[4], (1, 2 * H), 2 * H),
        "b3": u(ks[5], (1,), 2 * H),
    }


def reference_forward(states, actions, p):
    """Pure-JAX reference matching the PyTorch module exactly."""
    h = jnp.maximum(states @ p["W1"].T + p["b1"], 0.0)
    cat = jnp.concatenate([h, actions], axis=1)
    z = jnp.maximum(cat @ p["W2"].T + p["b2"], 0.0)
    return z @ p["W3"].T + p["b3"]


if __name__ == "__main__":
    # Small shapes consistent with the module: state dim 4, action dim 1,
    # hidden 32, batch 8.
    B, S, A, H = 8, 4, 1, 32

    key = jax.random.PRNGKey(0)
    k_s, k_a, k_p = jax.random.split(key, 3)
    states = jax.random.normal(k_s, (B, S), dtype=jnp.float32)
    actions = jax.random.normal(k_a, (B, A), dtype=jnp.float32)
    params = init_params(k_p, S, A, H)

    q_ref = reference_forward(states, actions, params)

    # f32 operand path (tolerance allows for TPU MXU matmul pass behavior).
    q32 = jax.block_until_ready(
        qnetwork_forward(states, actions, params, compute_dtype=jnp.float32))
    assert q32.shape == (B, 1)
    assert jnp.allclose(q32, q_ref, atol=2e-2, rtol=2e-2)

    # Default bf16 matmul-operand path (f32 accumulation / bias / ReLU);
    # inputs are quantized to bf16, hence the looser tolerance.
    qbf = jax.block_until_ready(qnetwork_forward(states, actions, params))
    assert qbf.shape == (B, 1)
    assert jnp.allclose(qbf, q_ref, atol=8e-2, rtol=8e-2)

    # Exercise the multi-tile path (grid >= 2, balanced 128-aligned tiles).
    BL = 300
    sl = jax.random.normal(jax.random.PRNGKey(1), (BL, S), dtype=jnp.float32)
    al = jax.random.normal(jax.random.PRNGKey(2), (BL, A), dtype=jnp.float32)
    ql = jax.block_until_ready(qnetwork_forward(sl, al, params))
    assert ql.shape == (BL, 1)
    assert jnp.allclose(ql, reference_forward(sl, al, params), atol=8e-2, rtol=8e-2)

    print("KERNEL_OK")
</pallas_src>

<mosaic_0001>
module attributes {stable_mosaic.version = 11 : i64} {
  func.func @kernel(%arg0: i32, %arg1: memref<8x8xf32, #tpu.memory_space<vmem>>, %arg2: memref<56x128xf32, #tpu.memory_space<vmem>>, %arg3: memref<3x128xf32, #tpu.memory_space<vmem>>, %arg4: memref<1x8xf32, #tpu.memory_space<vmem>>) attributes {dimension_semantics = [#tpu.dimension_semantics<parallel>], iteration_bounds = array<i64: 1>, scalar_prefetch = 0 : i64, scratch_operands = 0 : i64, tpu.core_type = #tpu.core_type<tc>, window_params = [{transform_indices = @transform_0, window_bounds = array<i64: 8, 8>}, {pipeline_mode = #tpu.pipeline_mode<synchronous>, transform_indices = @transform_1, window_bounds = array<i64: 56, 128>}, {pipeline_mode = #tpu.pipeline_mode<synchronous>, transform_indices = @transform_2, window_bounds = array<i64: 3, 128>}, {transform_indices = @transform_3, window_bounds = array<i64: 1, 8>}]} {
    %c0 = arith.constant 0 : index
    %c0_0 = arith.constant 0 : index
    %0 = vector.load %arg1[%c0, %c0_0] : memref<8x8xf32, #tpu.memory_space<vmem>>, vector<8x8xf32>
    %c0_1 = arith.constant 0 : index
    %c0_2 = arith.constant 0 : index
    %1 = vector.load %arg2[%c0_1, %c0_2] : memref<56x128xf32, #tpu.memory_space<vmem>>, vector<8x128xf32>
    %cst = arith.constant dense<0.000000e+00> : vector<8x128xf32>
    %2 = tpu.matmul %0, %1, %cst {dimension_numbers = #tpu.dot_dimension_numbers<[1], [0], [0], [1], [0, 0, 1, 1], [], []>} : vector<8x8xf32>, vector<8x128xf32>, vector<8x128xf32> -> vector<8x128xf32>
    %c0_3 = arith.constant 0 : index
    %c0_4 = arith.constant 0 : index
    %3 = vector.load %arg3[%c0_3, %c0_4] : memref<3x128xf32, #tpu.memory_space<vmem>>, vector<1x128xf32>
    %4 = vector.broadcast %3 : vector<1x128xf32> to vector<8x128xf32>
    %5 = arith.addf %2, %4 : vector<8x128xf32>
    %cst_5 = arith.constant 0.000000e+00 : f32
    %6 = vector.broadcast %cst_5 : f32 to vector<8x128xf32>
    %7 = arith.maximumf %5, %6 : vector<8x128xf32>
    %8 = vector.extract_strided_slice %7 {offsets = [0, 0], sizes = [8, 32], strides = [1, 1]} : vector<8x128xf32> to vector<8x32xf32>
    %c8 = arith.constant 8 : index
    %c0_6 = arith.constant 0 : index
    %9 = vector.load %arg2[%c8, %c0_6] : memref<56x128xf32, #tpu.memory_space<vmem>>, vector<32x128xf32>
    %cst_7 = arith.constant dense<0.000000e+00> : vector<8x128xf32>
    %10 = tpu.matmul %8, %9, %cst_7 {dimension_numbers = #tpu.dot_dimension_numbers<[1], [0], [0], [1], [0, 0, 1, 1], [], []>} : vector<8x32xf32>, vector<32x128xf32>, vector<8x128xf32> -> vector<8x128xf32>
    %c40 = arith.constant 40 : index
    %c0_8 = arith.constant 0 : index
    %11 = vector.load %arg2[%c40, %c0_8] : memref<56x128xf32, #tpu.memory_space<vmem>>, vector<8x128xf32>
    %cst_9 = arith.constant dense<0.000000e+00> : vector<8x128xf32>
    %12 = tpu.matmul %0, %11, %cst_9 {dimension_numbers = #tpu.dot_dimension_numbers<[1], [0], [0], [1], [0, 0, 1, 1], [], []>} : vector<8x8xf32>, vector<8x128xf32>, vector<8x128xf32> -> vector<8x128xf32>
    %13 = arith.addf %10, %12 : vector<8x128xf32>
    %c1 = arith.constant 1 : index
    %c0_10 = arith.constant 0 : index
    %14 = vector.load %arg3[%c1, %c0_10] : memref<3x128xf32, #tpu.memory_space<vmem>>, vector<1x128xf32>
    %15 = vector.broadcast %14 : vector<1x128xf32> to vector<8x128xf32>
    %16 = arith.addf %13, %15 : vector<8x128xf32>
    %cst_11 = arith.constant 0.000000e+00 : f32
    %17 = vector.broadcast %cst_11 : f32 to vector<8x128xf32>
    %18 = arith.maximumf %16, %17 : vector<8x128xf32>
    %c48 = arith.constant 48 : index
    %c0_12 = arith.constant 0 : index
    %19 = vector.load %arg2[%c48, %c0_12] : memref<56x128xf32, #tpu.memory_space<vmem>>, vector<1x128xf32>
    %cst_13 = arith.constant dense<0.000000e+00> : vector<1x8xf32>
    %20 = tpu.matmul %19, %18, %cst_13 {dimension_numbers = #tpu.dot_dimension_numbers<[1], [1], [0], [0], [0, 0, 1, 0], [], []>} : vector<1x128xf32>, vector<8x128xf32>, vector<1x8xf32> -> vector<1x8xf32>
    %c2 = arith.constant 2 : index
    %c0_14 = arith.constant 0 : index
    %21 = vector.load %arg3[%c2, %c0_14] : memref<3x128xf32, #tpu.memory_space<vmem>>, vector<1x1xf32>
    %22 = vector.broadcast %21 : vector<1x1xf32> to vector<1x8xf32>
    %23 = arith.addf %20, %22 : vector<1x8xf32>
    %c0_15 = arith.constant 0 : index
    %c0_16 = arith.constant 0 : index
    %24 = vector.load %arg4[%c0_15, %c0_16] : memref<1x8xf32, #tpu.memory_space<vmem>>, vector<1x8xf32>
    tpu.vector_store %arg4[%c0_15, %c0_16], %23 {strides = array<i32>} : memref<1x8xf32, #tpu.memory_space<vmem>>, vector<1x8xf32>,
    return
  }
  func.func @transform_0(%arg0: i32) -> (i32, i32) {
    %c0_i32 = arith.constant 0 : i32
    %c0_i32_0 = arith.constant 0 : i32
    return %arg0, %c0_i32 : i32, i32
  }
  func.func @transform_1(%arg0: i32) -> (i32, i32) {
    %c0_i32 = arith.constant 0 : i32
    %c0_i32_0 = arith.constant 0 : i32
    %c0_i32_1 = arith.constant 0 : i32
    return %c0_i32, %c0_i32_0 : i32, i32
  }
  func.func @transform_2(%arg0: i32) -> (i32, i32) {
    %c0_i32 = arith.constant 0 : i32
    %c0_i32_0 = arith.constant 0 : i32
    %c0_i32_1 = arith.constant 0 : i32
    return %c0_i32, %c0_i32_0 : i32, i32
  }
  func.func @transform_3(%arg0: i32) -> (i32, i32) {
    %c0_i32 = arith.constant 0 : i32
    %c0_i32_0 = arith.constant 0 : i32
    return %c0_i32, %arg0 : i32, i32
  }
}

</mosaic_0001>

<bundles_post_ra>
// kernel: tpu_custom_call.1
= control target key start
LH: loop header
LB: loop body
LE: loop exit
PB: predicated region body
PF: predicated region fallthrough
CT: control target
= control target key end

     0   :  { %8 = vsyncpa [#allocation3], 0  ;;  %s591_s0 = inlined_call_operand.hbm [shape: f32[8,8], index: 0, kind: input, shape index: {}]   ;;  %s592_s1 = inlined_call_operand.hbm [shape: f32[56,128], index: 1, kind: input, shape index: {}]   ;;  %s593_s2 = inlined_call_operand.vmem [shape: f32[3,128], index: 2, kind: input, shape index: {}]   ;;  %s594_s3 = inlined_call_operand.hbm [shape: f32[1,8], index: 3, kind: output, shape index: {}]  }
   0x1   :  { %9 = vsyncpa [#allocation6], 0 }
   0x2   :  { %10 = vsyncpa [#allocation4], 0  ;;  %s504_s12 = smov [#allocation2]   ;;  %s505_s14 = smov [#allocation5]  }
   0x3   :  { %s17_s13 = sshll.u32 %s504_s12, 4  ;;  %s26_s15 = sshll.u32 %s505_s14, 4  ;;  %s18_s13 = int_to_ptr.vmem [resolvable:$true] %s17_s13  ;;  %s533_s15 = int_to_ptr.vmem [resolvable:$true] %s26_s15 }
   0x4   :  { %s432_s18 = scalar_lea.hbm %s591_s0, 128 }
   0x5   :  { %p433_p0 = scmp.ne.s32.totalorder %s591_s0, %s432_s18  ;;  %p436_p1 = scmp.lt.u32.totalorder %s432_s18, %s591_s0 }
   0x7   :  { %p438_p2 = pnand %p436_p1, %p433_p0 }
   0x9   :  { %441 = shalt.err (!%p438_p2)
}
   0xa   :  { %s442_s23 = scalar_lea.vmem %s18_s13, 128  ;;  %p447_p4 = scmp.lt.s32.totalorder %s18_s13, %s18_s13 }
   0xb   :  { %p443_p3 = scmp.ne.s32.totalorder %s18_s13, %s442_s23  ;;  %p448_p5 = scmp.lt.s32.totalorder %s442_s23, %s442_s23 }
   0xd   :  { %p449_p6 = por %p448_p5, %p447_p4 }
   0xf   :  { %p450_p7 = pnand %p449_p6, %p443_p3 }
  0x11   :  { %453 = shalt.err (!%p450_p7)
}
  0x12   :  { %20 = dma.hbm_to_vmem [thread:$0]  %s591_s0, 128, %s18_s13, [#allocation3]  }
  0x13   :  { %s454_s28 = scalar_lea.hbm %s592_s1, 896 }
  0x14   :  { %p455_p8 = scmp.ne.s32.totalorder %s592_s1, %s454_s28  ;;  %p458_p9 = scmp.lt.u32.totalorder %s454_s28, %s592_s1 }
  0x16   :  { %p460_p10 = pnand %p458_p9, %p455_p8 }
  0x18   :  { %463 = shalt.err (!%p460_p10)
}
  0x19   :  { %s464_s6 = scalar_lea.vmem %s533_s15, 896  ;;  %p469_p12 = scmp.lt.s32.totalorder %s533_s15, %s533_s15 }
  0x1a   :  { %p465_p11 = scmp.ne.s32.totalorder %s533_s15, %s464_s6  ;;  %p470_p13 = scmp.lt.s32.totalorder %s464_s6, %s464_s6 }
  0x1c   :  { %p471_p0 = por %p470_p13, %p469_p12 }
  0x1e   :  { %p472_p1 = pnand %p471_p0, %p465_p11 }
  0x20   :  { %475 = shalt.err (!%p472_p1)
}
  0x21   :  { %s506_s0 = smov 128   ;;  %s507_s7 = smov 8  }
  0x22   :  { %32 = dma.hbm_to_vmem [thread:$0]  %s592_s1, 896, %s533_s15, [#allocation6], %s506_s0, %s506_s0, %s507_s7  }
  0x23   :  { %498 = dma.done.wait [#allocation3], 128  }
  0x24   :  { %499 = vsyncadd [#allocation3], 4294967168 }
  0x25   :  { %500 = dma.done.wait [#allocation6], 896  }
  0x26   :  { %501 = vsyncadd [#allocation6], 4294966400  ;;  %v508_v0 = vmov 0.0   ;;  %vm509_vm0 = vmmov 0   ;;  %vm48_vm1 = vcmask 64512   ;;  %v42_v1 = vld [vmem:[#allocation5] sm:$0xff] }
  0x27   :  { %390 = vmatprep.subr.mxu0 %v508_v0  ;;  %392 = vmatprep.mubr.msk.f32.mxu0 %vm509_vm0, %v508_v0  ;;  %v41_v2 = vld [vmem:[#allocation2] sm:$0xff]  ;;  %v123_v3 = vld [vmem:[#allocation5 + $0x8] sm:$0xff]  ;;  %v124_v4 = vld [vmem:[#allocation5 + $0x10] sm:$0xff]  ;;  %v510_v5 = vmov 0.0|0.0   ;;  %vm198_vm2 = vcmask 261120   ;;  %v511_v19 = vmov 0  }
  0x28   :  { %395 = vmatprep.subr.mxu1 %v508_v0  ;;  %397 = vmatprep.mubr.msk.f32.mxu1 %vm509_vm0, %v508_v0  ;;  %v417_v6 = vpack.c.bf16 %v124_v4, %v123_v3  ;;  %v125_v7 = vld [vmem:[#allocation5 + $0x18] sm:$0xff]  ;;  %v126_v8 = vld [vmem:[#allocation5 + $0x20] sm:$0xff]  ;;  %v127_v10 = vld [vmem:[#allocation5 + $0x28] sm:$0xff]  ;;  %s512_s15 = smov [#allocation7]   ;;  %vm356_vm3 = vcmask 57344  }
  0x29   :  { %391 = vmatpush3.msra.mxu0 %v42_v1  ;;  %v420_v9 = vpack.c.bf16 %v126_v8, %v125_v7  ;;  %396 = vmatpush3.msra.mxu1 %v127_v10  ;;  %v374_v11 = vld [vmem:[%s593_s2] ss:$0 sm:$0xff]  ;;  %v280_v18 = vld [vmem:[%s593_s2 + $0x2] sm:$0x1]  ;;  %v378_v21 = vld [vmem:[%s593_s2 + $0x1] ss:$0 sm:$0xff] }
  0x2a   :  { %393 = vmatmul.mubr.msk.f32.vlgmr.msra.gmra.mrb[0].mxu0 %vm48_vm1, %v41_v2  ;;  %416 = vmatprep.subr.bf16.mxu0 %v510_v5  ;;  %v279_v26 = vld [vmem:[#allocation5 + $0x30] sm:$0x1]  ;;  %s364_s16 = sshll.u32 %s512_s15, 4  ;;  %s365_s16 = int_to_ptr.vmem [resolvable:$true] %s364_s16 }
  0x2b   :  { %408 = vmatprep.mubr.msk.f32.mxu0 %vm509_vm0, %v508_v0  ;;  %418 = vmatpush3.bf16.msra.mxu0 %v417_v6  ;;  %s476_s17 = scalar_lea.vmem %s365_s16, 16  ;;  %s480_s18 = scalar_lea.vmem %s365_s16, 32 }
  0x2c   :  { %419 = vmatprep.subr.bf16.mxu0 %v510_v5  ;;  %398 = vmatmul.mubr.msk.f32.vlgmr.msra.gmra.mrb[0].mxu1 %vm48_vm1, %v41_v2  ;;  %p477_p2 = scmp.ne.s32.totalorder %s365_s16, %s476_s17  ;;  %p481_p3 = scmp.lt.s32.totalorder %s365_s16, %s365_s16 }
  0x2d   :  { %411 = vmatprep.subr.mxu1 %v508_v0  ;;  %413 = vmatprep.mubr.msk.f32.mxu1 %vm509_vm0, %v508_v0  ;;  %p482_p4 = scmp.lt.s32.totalorder %s480_s18, %s476_s17 }
  0x2e   :  { %431 = vset.pattern.permute.xlu0 %v511_v19 }
  0x2f   :  { %421 = vmatpush3.bf16.msra.mxu0 %v420_v9  ;;  %283 = vperm.xlu0 %431, %v280_v18   ;;  %p483_p5 = por %p482_p4, %p481_p3 }
  0x31   :  { %p484_p6 = pnand %p483_p5, %p477_p2 }
  0xae   :  { %v284_v27 = vpop.permute.xlu0 %283 }
  0xfd   :  { %v118_v12 = vpop.f32.mrb[0].mxu0 }
  0xfe   :  { %v119_v13 = vadd.f32 %v374_v11, %v118_v12  ;;  %v394_v14 = vpop.f32.mrb[1].mxu0 }
  0xff   :  { %v194_v16 = vpop.f32.mrb[0].mxu1 }
 0x100   :  { %v122_v15 = vmax.f32 %v119_v13, 0.0  ;;  %v399_v17 = vpop.f32.mrb[1].mxu1 }
 0x102   :  { %409 = vmatmul.mubr.msk.f32.vlgmr.msra.gmra.mrb[2].mxu0 %vm198_vm2, %v122_v15 }
 0x1d5   :  { %v268_v20 = vpop.f32.mrb[2].mxu0 }
 0x1d6   :  { %v269_v22 = vadd.f32 %v268_v20, %v194_v16  ;;  %v410_v23 = vpop.f32.mrb[3].mxu0 }
 0x1d8   :  { %v277_v24 = vadd.f32 %v378_v21, %v269_v22 }
 0x1da   :  { %v278_v25 = vmax.f32 %v277_v24, 0.0 }
 0x1dc   :  { %412 = vmatpush3.xpose.msra.mxu1 %v278_v25 }
 0x1df   :  { %414 = vmatmul.mubr.f32.vlgmr.msra.gmra.mrb[2].mxu1 %v279_v26 }
 0x2b2   :  { %v352_v28 = vpop.f32.mrb[2].mxu1 }
 0x2b3   :  { %v353_v29 = vadd.f32 %v352_v28, %v284_v27  ;;  %v415_v30 = vpop.f32.mrb[3].mxu1 }
 0x2b5   :  { %357 = vst.msk [vmem:[#allocation7] sm:$0x1] %vm356_vm3, %v353_v29 }
 0x2b6   :  { %487 = shalt.err (!%p484_p6)
}
 0x2b7   :  { %s488_s20 = scalar_lea.hbm %s594_s3, 16 }
 0x2b8   :  { %p489_p7 = scmp.ne.s32.totalorder %s594_s3, %s488_s20  ;;  %p492_p8 = scmp.lt.u32.totalorder %s488_s20, %s594_s3 }
 0x2ba   :  { %p494_p9 = pnand %p492_p8, %p489_p7 }
 0x2bc   :  { %497 = shalt.err (!%p494_p9)
}
 0x2bd   :  { %367 = dma.vmem_to_hbm [thread:$0]  %s365_s16, 16, %s594_s3, [#allocation4]  }
 0x2be   :  { %502 = dma.done.wait [#allocation4], 16  }
 0x2bf   :  { %503 = vsyncadd [#allocation4], 4294967280 }
 0x2c0   :  { %371 = vsyncpa [#allocation3], 1 }
 0x2c1   :  { %372 = vsyncpa [#allocation6], 1 }
 0x2c2   :  { %373 = vsyncpa [#allocation4], 1 }

</bundles_post_ra>
